<compile_context>
chip_gen: v7x
topology: tpu7x:2x2x1
jax: 0.10.0
libtpu: 0.0.40
codegen_flags: <defaults>
</compile_context>

<pallas_src>
import jax
import jax.numpy as jnp
from jax.experimental import pallas as pl
from jax.experimental.pallas import tpu as pltpu


def _round_up(n: int, m: int) -> int:
    return -(-n // m) * m


def dqn_kernel(x_ref, w0_ref, w1_ref, w2_ref, w3_ref, b_ref, out_ref):
    """One batch tile: 4 matmuls (bf16 in, f32 acc) + bias adds + 3 ReLUs."""
    h_dim = w0_ref.shape[1]
    o_dim = w3_ref.shape[1]

    x = x_ref[...]  # bf16 (tb, input_dim)

    # layer 1: input_layer + ReLU
    h = jnp.dot(x, w0_ref[...], preferred_element_type=jnp.float32)
    h = jnp.maximum(h + b_ref[0:1, :h_dim], 0.0)

    # layer 2: hidden1 + ReLU
    h = jnp.dot(h.astype(w1_ref.dtype), w1_ref[...],
                preferred_element_type=jnp.float32)
    h = jnp.maximum(h + b_ref[1:2, :h_dim], 0.0)

    # layer 3: hidden2 + ReLU
    h = jnp.dot(h.astype(w2_ref.dtype), w2_ref[...],
                preferred_element_type=jnp.float32)
    h = jnp.maximum(h + b_ref[2:3, :h_dim], 0.0)

    # layer 4: output_layer (no activation); unpadded (tb, out_dim) store.
    y = jnp.dot(h.astype(w3_ref.dtype), w3_ref[...],
                preferred_element_type=jnp.float32)
    y = y + b_ref[3:4, :o_dim]
    out_ref[...] = y.astype(out_ref.dtype)


def dqn_forward(x, params, *, block_batch=4096):
    """x: (B, input_dim) f32; params: list of (W, b), W (in, out), b (1, out)."""
    batch, input_dim = x.shape
    hidden = params[0][0].shape[1]
    out_dim = params[-1][0].shape[1]

    # bf16 matmul inputs (f32 accumulation inside the kernel).
    w0, w1, w2, w3 = (p[0].astype(jnp.bfloat16) for p in params)

    # Pack the four tiny biases into one f32 slab -> single resident DMA.
    slab_w = max(hidden, out_dim)
    bias_slab = jnp.zeros((4, slab_w), jnp.float32)
    for i, (_, b) in enumerate(params):
        bias_slab = bias_slab.at[i, :b.shape[-1]].set(
            b.reshape(-1).astype(jnp.float32))

    # Batch tile: multiple of 8 sublanes; cap at ceil(batch/2) so the
    # "parallel" grid axis has >=2 steps (sharded across v7x's 2 TensorCores).
    tb = max(8, min(int(block_batch), _round_up(-(-batch // 2), 8)))
    padded_batch = _round_up(batch, tb)

    x_in = x.astype(jnp.bfloat16)
    if padded_batch != batch:
        x_in = jnp.zeros((padded_batch, input_dim), jnp.bfloat16).at[:batch].set(x_in)

    grid = (padded_batch // tb,)

    flops = 2 * padded_batch * (input_dim * hidden + 2 * hidden * hidden
                                + hidden * out_dim)
    bytes_accessed = (2 * (x_in.size + w0.size + w1.size + w2.size + w3.size)
                      + 4 * bias_slab.size
                      + 4 * padded_batch * out_dim)

    out = pl.pallas_call(
        dqn_kernel,
        out_shape=jax.ShapeDtypeStruct((padded_batch, out_dim), jnp.float32),
        grid=grid,
        in_specs=[
            # x: tiled along batch.
            pl.BlockSpec((tb, input_dim), lambda i: (i, 0)),
            # Weights / bias slab: constant block index -> VMEM-resident.
            pl.BlockSpec(w0.shape, lambda i: (0, 0)),
            pl.BlockSpec(w1.shape, lambda i: (0, 0)),
            pl.BlockSpec(w2.shape, lambda i: (0, 0)),
            pl.BlockSpec(w3.shape, lambda i: (0, 0)),
            pl.BlockSpec(bias_slab.shape, lambda i: (0, 0)),
        ],
        # Last dim == full array dim (out_dim), so the unpadded block is legal.
        out_specs=pl.BlockSpec((tb, out_dim), lambda i: (i, 0)),
        compiler_params=pltpu.CompilerParams(
            dimension_semantics=("parallel",),
        ),
        cost_estimate=pl.CostEstimate(flops=flops, transcendentals=0,
                                      bytes_accessed=bytes_accessed),
    )(x_in, w0, w1, w2, w3, bias_slab)

    return out[:batch]


def xavier_uniform(key, fan_in, fan_out, dtype=jnp.float32):
    # Matches torch.nn.init.xavier_uniform_ (gain=1): U(-a, a), a = sqrt(6/(fi+fo))
    a = (6.0 / (fan_in + fan_out)) ** 0.5
    return jax.random.uniform(key, (fan_in, fan_out), dtype=dtype, minval=-a, maxval=a)


def init_dqn_params(key, input_dim, output_dim, hidden_dim=64):
    dims = [(input_dim, hidden_dim),
            (hidden_dim, hidden_dim),
            (hidden_dim, hidden_dim),
            (hidden_dim, output_dim)]
    keys = jax.random.split(key, len(dims))
    params = []
    for k, (fi, fo) in zip(keys, dims):
        w = xavier_uniform(k, fi, fo)              # (in, out) == PyTorch weight.T
        b = jnp.zeros((1, fo), dtype=jnp.float32)  # bias zero-init, as in module
        params.append((w, b))
    return params


def dqn_reference(x, params, matmul_dtype=jnp.float32):
    """Plain-JAX reference of the PyTorch forward (matching matmul dtype)."""
    h = x
    for i, (w, b) in enumerate(params):
        h = jnp.dot(h.astype(matmul_dtype), w.astype(matmul_dtype),
                    preferred_element_type=jnp.float32) + b
        if i < len(params) - 1:
            h = jnp.maximum(h, 0.0)
    return h


if __name__ == "__main__":
    key = jax.random.PRNGKey(0)
    k_param, k_x1, k_x2 = jax.random.split(key, 3)

    batch, input_dim, hidden_dim, output_dim = 8, 16, 64, 4
    params = init_dqn_params(k_param, input_dim, output_dim, hidden_dim)

    # Small-batch check (single grid step).
    x_small = jax.random.normal(k_x1, (batch, input_dim), dtype=jnp.float32)
    out_small = jax.block_until_ready(dqn_forward(x_small, params))
    ref_small = dqn_reference(x_small, params, matmul_dtype=jnp.bfloat16)
    assert out_small.shape == (batch, output_dim)
    assert jnp.allclose(out_small, ref_small, atol=1e-2, rtol=1e-2), "small-batch mismatch"

    # Larger batch with multiple grid steps (weights resident across steps).
    big_batch = 512
    x_big = jax.random.normal(k_x2, (big_batch, input_dim), dtype=jnp.float32)
    out_big = jax.block_until_ready(dqn_forward(x_big, params, block_batch=128))
    ref_big = dqn_reference(x_big, params, matmul_dtype=jnp.bfloat16)
    assert out_big.shape == (big_batch, output_dim)
    assert jnp.allclose(out_big, ref_big, atol=1e-2, rtol=1e-2), "big-batch mismatch"

    print("KERNEL_OK")
</pallas_src>

<mosaic_0001>
module attributes {stable_mosaic.version = 11 : i64} {
  func.func @dqn_kernel(%arg0: i32, %arg1: memref<8x16xbf16, #tpu.memory_space<vmem>>, %arg2: memref<16x64xbf16, #tpu.memory_space<vmem>>, %arg3: memref<64x64xbf16, #tpu.memory_space<vmem>>, %arg4: memref<64x64xbf16, #tpu.memory_space<vmem>>, %arg5: memref<64x4xbf16, #tpu.memory_space<vmem>>, %arg6: memref<4x64xf32, #tpu.memory_space<vmem>>, %arg7: memref<8x4xf32, #tpu.memory_space<vmem>>) attributes {dimension_semantics = [#tpu.dimension_semantics<parallel>], iteration_bounds = array<i64: 1>, scalar_prefetch = 0 : i64, scratch_operands = 0 : i64, tpu.core_type = #tpu.core_type<tc>, window_params = [{transform_indices = @transform_0, window_bounds = array<i64: 8, 16>}, {pipeline_mode = #tpu.pipeline_mode<synchronous>, transform_indices = @transform_1, window_bounds = array<i64: 16, 64>}, {pipeline_mode = #tpu.pipeline_mode<synchronous>, transform_indices = @transform_2, window_bounds = array<i64: 64, 64>}, {pipeline_mode = #tpu.pipeline_mode<synchronous>, transform_indices = @transform_3, window_bounds = array<i64: 64, 64>}, {pipeline_mode = #tpu.pipeline_mode<synchronous>, transform_indices = @transform_4, window_bounds = array<i64: 64, 4>}, {pipeline_mode = #tpu.pipeline_mode<synchronous>, transform_indices = @transform_5, window_bounds = array<i64: 4, 64>}, {transform_indices = @transform_6, window_bounds = array<i64: 8, 4>}]} {
    %c0 = arith.constant 0 : index
    %c0_0 = arith.constant 0 : index
    %0 = vector.load %arg1[%c0, %c0_0] : memref<8x16xbf16, #tpu.memory_space<vmem>>, vector<8x16xbf16>
    %c0_1 = arith.constant 0 : index
    %c0_2 = arith.constant 0 : index
    %1 = vector.load %arg2[%c0_1, %c0_2] : memref<16x64xbf16, #tpu.memory_space<vmem>>, vector<16x64xbf16>
    %cst = arith.constant dense<0.000000e+00> : vector<8x64xf32>
    %2 = tpu.matmul %0, %1, %cst {dimension_numbers = #tpu.dot_dimension_numbers<[1], [0], [0], [1], [0, 0, 1, 1], [], []>} : vector<8x16xbf16>, vector<16x64xbf16>, vector<8x64xf32> -> vector<8x64xf32>
    %c0_3 = arith.constant 0 : index
    %c0_4 = arith.constant 0 : index
    %3 = vector.load %arg6[%c0_3, %c0_4] : memref<4x64xf32, #tpu.memory_space<vmem>>, vector<1x64xf32>
    %4 = vector.broadcast %3 : vector<1x64xf32> to vector<8x64xf32>
    %5 = arith.addf %2, %4 : vector<8x64xf32>
    %cst_5 = arith.constant 0.000000e+00 : f32
    %6 = vector.broadcast %cst_5 : f32 to vector<8x64xf32>
    %7 = arith.maximumf %5, %6 : vector<8x64xf32>
    %8 = arith.truncf %7 : vector<8x64xf32> to vector<8x64xbf16>
    %c0_6 = arith.constant 0 : index
    %c0_7 = arith.constant 0 : index
    %9 = vector.load %arg3[%c0_6, %c0_7] : memref<64x64xbf16, #tpu.memory_space<vmem>>, vector<64x64xbf16>
    %cst_8 = arith.constant dense<0.000000e+00> : vector<8x64xf32>
    %10 = tpu.matmul %8, %9, %cst_8 {dimension_numbers = #tpu.dot_dimension_numbers<[1], [0], [0], [1], [0, 0, 1, 1], [], []>} : vector<8x64xbf16>, vector<64x64xbf16>, vector<8x64xf32> -> vector<8x64xf32>
    %c1 = arith.constant 1 : index
    %c0_9 = arith.constant 0 : index
    %11 = vector.load %arg6[%c1, %c0_9] : memref<4x64xf32, #tpu.memory_space<vmem>>, vector<1x64xf32>
    %12 = vector.broadcast %11 : vector<1x64xf32> to vector<8x64xf32>
    %13 = arith.addf %10, %12 : vector<8x64xf32>
    %cst_10 = arith.constant 0.000000e+00 : f32
    %14 = vector.broadcast %cst_10 : f32 to vector<8x64xf32>
    %15 = arith.maximumf %13, %14 : vector<8x64xf32>
    %16 = arith.truncf %15 : vector<8x64xf32> to vector<8x64xbf16>
    %c0_11 = arith.constant 0 : index
    %c0_12 = arith.constant 0 : index
    %17 = vector.load %arg4[%c0_11, %c0_12] : memref<64x64xbf16, #tpu.memory_space<vmem>>, vector<64x64xbf16>
    %cst_13 = arith.constant dense<0.000000e+00> : vector<8x64xf32>
    %18 = tpu.matmul %16, %17, %cst_13 {dimension_numbers = #tpu.dot_dimension_numbers<[1], [0], [0], [1], [0, 0, 1, 1], [], []>} : vector<8x64xbf16>, vector<64x64xbf16>, vector<8x64xf32> -> vector<8x64xf32>
    %c2 = arith.constant 2 : index
    %c0_14 = arith.constant 0 : index
    %19 = vector.load %arg6[%c2, %c0_14] : memref<4x64xf32, #tpu.memory_space<vmem>>, vector<1x64xf32>
    %20 = vector.broadcast %19 : vector<1x64xf32> to vector<8x64xf32>
    %21 = arith.addf %18, %20 : vector<8x64xf32>
    %cst_15 = arith.constant 0.000000e+00 : f32
    %22 = vector.broadcast %cst_15 : f32 to vector<8x64xf32>
    %23 = arith.maximumf %21, %22 : vector<8x64xf32>
    %24 = arith.truncf %23 : vector<8x64xf32> to vector<8x64xbf16>
    %c0_16 = arith.constant 0 : index
    %c0_17 = arith.constant 0 : index
    %25 = vector.load %arg5[%c0_16, %c0_17] : memref<64x4xbf16, #tpu.memory_space<vmem>>, vector<64x4xbf16>
    %cst_18 = arith.constant dense<0.000000e+00> : vector<8x4xf32>
    %26 = tpu.matmul %24, %25, %cst_18 {dimension_numbers = #tpu.dot_dimension_numbers<[1], [0], [0], [1], [0, 0, 1, 1], [], []>} : vector<8x64xbf16>, vector<64x4xbf16>, vector<8x4xf32> -> vector<8x4xf32>
    %c3 = arith.constant 3 : index
    %c0_19 = arith.constant 0 : index
    %27 = vector.load %arg6[%c3, %c0_19] : memref<4x64xf32, #tpu.memory_space<vmem>>, vector<1x4xf32>
    %28 = vector.broadcast %27 : vector<1x4xf32> to vector<8x4xf32>
    %29 = arith.addf %26, %28 : vector<8x4xf32>
    %c0_20 = arith.constant 0 : index
    %c0_21 = arith.constant 0 : index
    %30 = vector.load %arg7[%c0_20, %c0_21] : memref<8x4xf32, #tpu.memory_space<vmem>>, vector<8x4xf32>
    tpu.vector_store %arg7[%c0_20, %c0_21], %29 {strides = array<i32>} : memref<8x4xf32, #tpu.memory_space<vmem>>, vector<8x4xf32>,
    return
  }
  func.func @transform_0(%arg0: i32) -> (i32, i32) {
    %c0_i32 = arith.constant 0 : i32
    %c0_i32_0 = arith.constant 0 : i32
    return %arg0, %c0_i32 : i32, i32
  }
  func.func @transform_1(%arg0: i32) -> (i32, i32) {
    %c0_i32 = arith.constant 0 : i32
    %c0_i32_0 = arith.constant 0 : i32
    %c0_i32_1 = arith.constant 0 : i32
    return %c0_i32, %c0_i32_0 : i32, i32
  }
  func.func @transform_2(%arg0: i32) -> (i32, i32) {
    %c0_i32 = arith.constant 0 : i32
    %c0_i32_0 = arith.constant 0 : i32
    %c0_i32_1 = arith.constant 0 : i32
    return %c0_i32, %c0_i32_0 : i32, i32
  }
  func.func @transform_3(%arg0: i32) -> (i32, i32) {
    %c0_i32 = arith.constant 0 : i32
    %c0_i32_0 = arith.constant 0 : i32
    %c0_i32_1 = arith.constant 0 : i32
    return %c0_i32, %c0_i32_0 : i32, i32
  }
  func.func @transform_4(%arg0: i32) -> (i32, i32) {
    %c0_i32 = arith.constant 0 : i32
    %c0_i32_0 = arith.constant 0 : i32
    %c0_i32_1 = arith.constant 0 : i32
    return %c0_i32, %c0_i32_0 : i32, i32
  }
  func.func @transform_5(%arg0: i32) -> (i32, i32) {
    %c0_i32 = arith.constant 0 : i32
    %c0_i32_0 = arith.constant 0 : i32
    %c0_i32_1 = arith.constant 0 : i32
    return %c0_i32, %c0_i32_0 : i32, i32
  }
  func.func @transform_6(%arg0: i32) -> (i32, i32) {
    %c0_i32 = arith.constant 0 : i32
    %c0_i32_0 = arith.constant 0 : i32
    return %arg0, %c0_i32 : i32, i32
  }
}

</mosaic_0001>

<bundles_post_ra>
// kernel: tpu_custom_call.1
= control target key start
LH: loop header
LB: loop body
LE: loop exit
PB: predicated region body
PF: predicated region fallthrough
CT: control target
= control target key end

     0   :  { %11 = vsyncpa [#allocation3], 0  ;;  %s648_s0 = inlined_call_operand.hbm [shape: bf16[8,16], index: 0, kind: input, shape index: {}]   ;;  %s649_s1 = inlined_call_operand.vmem [shape: bf16[16,64], index: 1, kind: input, shape index: {}]   ;;  %s650_s2 = inlined_call_operand.vmem [shape: bf16[64,64], index: 2, kind: input, shape index: {}]   ;;  %s651_s3 = inlined_call_operand.hbm [shape: bf16[64,64], index: 3, kind: input, shape index: {}]   ;;  %s652_s4 = inlined_call_operand.vmem [shape: bf16[64,4], index: 4, kind: input, shape index: {}]   ;;  %s653_s5 = inlined_call_operand.vmem [shape: f32[4,64], index: 5, kind: input, shape index: {}]   ;;  %s654_s6 = inlined_call_operand.vmem [shape: f32[8,4], index: 6, kind: output, shape index: {}]  }
   0x1   :  { %12 = vsyncpa [#allocation5], 0  ;;  %s510_s21 = smov [#allocation2]   ;;  %s511_s23 = smov [#allocation4]  }
   0x2   :  { %s19_s22 = sshll.u32 %s510_s21, 4  ;;  %s32_s24 = sshll.u32 %s511_s23, 4  ;;  %s20_s22 = int_to_ptr.vmem [resolvable:$true] %s19_s22  ;;  %s551_s24 = int_to_ptr.vmem [resolvable:$true] %s32_s24 }
   0x3   :  { %s462_s27 = scalar_lea.hbm %s648_s0, 64 }
   0x4   :  { %p463_p0 = scmp.ne.s32.totalorder %s648_s0, %s462_s27  ;;  %p466_p1 = scmp.lt.u32.totalorder %s462_s27, %s648_s0 }
   0x6   :  { %p468_p2 = pnand %p466_p1, %p463_p0 }
   0x8   :  { %471 = shalt.err (!%p468_p2)
}
   0x9   :  { %s472_s8 = scalar_lea.vmem %s20_s22, 64  ;;  %p477_p4 = scmp.lt.s32.totalorder %s20_s22, %s20_s22 }
   0xa   :  { %p473_p3 = scmp.ne.s32.totalorder %s20_s22, %s472_s8  ;;  %p478_p5 = scmp.lt.s32.totalorder %s472_s8, %s472_s8 }
   0xc   :  { %p479_p6 = por %p478_p5, %p477_p4 }
   0xe   :  { %p480_p7 = pnand %p479_p6, %p473_p3 }
  0x10   :  { %483 = shalt.err (!%p480_p7)
}
  0x11   :  { %22 = dma.hbm_to_vmem [thread:$0]  %s648_s0, 64, %s20_s22, [#allocation3]  }
  0x12   :  { %s484_s13 = scalar_lea.hbm %s651_s3, 512 }
  0x13   :  { %p485_p8 = scmp.ne.s32.totalorder %s651_s3, %s484_s13  ;;  %p488_p9 = scmp.lt.u32.totalorder %s484_s13, %s651_s3 }
  0x15   :  { %p490_p10 = pnand %p488_p9, %p485_p8 }
  0x17   :  { %493 = shalt.err (!%p490_p10)
}
  0x18   :  { %s494_s18 = scalar_lea.vmem %s551_s24, 512  ;;  %p499_p12 = scmp.lt.s32.totalorder %s551_s24, %s551_s24 }
  0x19   :  { %p495_p11 = scmp.ne.s32.totalorder %s551_s24, %s494_s18  ;;  %p500_p13 = scmp.lt.s32.totalorder %s494_s18, %s494_s18 }
  0x1b   :  { %p501_p0 = por %p500_p13, %p499_p12 }
  0x1d   :  { %p502_p1 = pnand %p501_p0, %p495_p11 }
  0x1f   :  { %505 = shalt.err (!%p502_p1)
}
  0x20   :  { %s512_s0 = smov 64   ;;  %s513_s19 = smov 4  }
  0x21   :  { %38 = dma.hbm_to_vmem [thread:$0]  %s651_s3, 512, %s551_s24, [#allocation5], %s512_s0, %s512_s0, %s513_s19  }
  0x22   :  { %506 = dma.done.wait [#allocation3], 64  }
  0x23   :  { %507 = vsyncadd [#allocation3], 4294967232 }
  0x24   :  { %508 = dma.done.wait [#allocation5], 512  }
  0x25   :  { %509 = vsyncadd [#allocation5], 4294966784  ;;  %v514_v0 = vmov 0.0   ;;  %vm515_vm0 = vmmov 0   ;;  %v449_v1 = vld [vmem:[%s649_s1] sm:$0xff]   ;;  %vm64_vm1 = vcmask 130048  }
  0x26   :  { %401 = vmatprep.subr.bf16.mxu0 %v514_v0  ;;  %403 = vmatprep.mubr.msk.bf16.mxu0 %vm515_vm0, %v514_v0  ;;  %v50_v2 = vld [vmem:[#allocation2] sm:$0xf]  ;;  %v451_v4 = vld [vmem:[%s650_s2 + $0x8] sm:$0xff]   ;;  %v452_v5 = vld [vmem:[%s650_s2 + $0x10] sm:$0xff]   ;;  %vm147_vm2 = vcmask 523264   ;;  %vm355_vm3 = vcmask 31744  }
  0x27   :  { %407 = vmatprep.subr.bf16.mxu1 %v514_v0  ;;  %415 = vmatprep.mubr.msk.bf16.mxu1 %vm515_vm0, %v514_v0  ;;  %v450_v3 = vld [vmem:[%s650_s2] sm:$0xff]   ;;  %v453_v6 = vld [vmem:[%s650_s2 + $0x18] sm:$0xff]   ;;  %v455_v8 = vld [vmem:[#allocation4 + $0x8] sm:$0xff]  }
  0x28   :  { %402 = vmatpush3.bf16.msra.mxu0 %v449_v1  ;;  %408 = vmatpush3.bf16.msra.mxu1 %v450_v3  ;;  %v454_v7 = vld [vmem:[#allocation4] sm:$0xff]   ;;  %v363_v9 = vld [vmem:[%s653_s5] ss:$0 sm:$0xff]  ;;  %v456_v17 = vld [vmem:[#allocation4 + $0x10] sm:$0xff]  }
  0x29   :  { %419 = vmatprep.subr.bf16.mxu0 %v514_v0  ;;  %409 = vmatprep.subr.bf16.mxu1 %v514_v0  ;;  %v457_v18 = vld [vmem:[#allocation4 + $0x18] sm:$0xff]   ;;  %v459_v20 = vld [vmem:[%s652_s4 + $0x8] sm:$0xff]   ;;  %v460_v29 = vld [vmem:[%s652_s4 + $0x10] sm:$0xff]  }
  0x2a   :  { %v458_v19 = vld [vmem:[%s652_s4] sm:$0xff]   ;;  %v461_v30 = vld [vmem:[%s652_s4 + $0x18] sm:$0xff]  }
  0x2b   :  { %404 = vmatmul.mubr.msk.bf16.vlgmr.msra.gmra.mrb[0].mxu0 %vm64_vm1, %v50_v2  ;;  %v366_v21 = vld [vmem:[%s653_s5 + $0x1] ss:$0 sm:$0xff]  ;;  %v372_v31 = vld [vmem:[%s653_s5 + $0x2] ss:$0 sm:$0xff]  ;;  %v378_v39 = vld [vmem:[%s653_s5 + $0x3] ss:$0 sm:$0xff] }
  0x2c   :  { %427 = vmatprep.mubr.msk.bf16.mxu0 %vm515_vm0, %v514_v0  ;;  %410 = vmatpush3.bf16.msra.mxu1 %v451_v4 }
  0x2d   :  { %411 = vmatprep.subr.bf16.mxu1 %v514_v0  ;;  %420 = vmatpush3.bf16.msra.mxu0 %v454_v7 }
  0x2e   :  { %421 = vmatprep.subr.bf16.mxu0 %v514_v0 }
  0x30   :  { %412 = vmatpush3.bf16.msra.mxu1 %v452_v5 }
  0x31   :  { %413 = vmatprep.subr.bf16.mxu1 %v514_v0  ;;  %422 = vmatpush3.bf16.msra.mxu0 %v455_v8 }
  0x32   :  { %423 = vmatprep.subr.bf16.mxu0 %v514_v0 }
  0x34   :  { %414 = vmatpush3.bf16.msra.mxu1 %v453_v6 }
  0x35   :  { %431 = vmatprep.subr.bf16.mxu1 %v514_v0  ;;  %424 = vmatpush3.bf16.msra.mxu0 %v456_v17 }
  0x36   :  { %425 = vmatprep.subr.bf16.mxu0 %v514_v0 }
  0x39   :  { %426 = vmatpush3.bf16.msra.mxu0 %v457_v18 }
  0xfe   :  { %v102_v10 = vpop.f32.mrb[0].mxu0 }
  0xff   :  { %v103_v11 = vadd.f32 %v363_v9, %v102_v10  ;;  %v405_v12 = vpop.f32.mrb[1].mxu0 }
 0x100   :  { %v105_v13 = vpop.f32.mrb[2].mxu0 }
 0x101   :  { %v108_v14 = vmax.f32 %v103_v11, 0.0  ;;  %v406_v15 = vpop.f32.mrb[3].mxu0 }
 0x103   :  { %v109_v16 = vpack.c.bf16 %v108_v14, %v108_v14 }
 0x105   :  { %416 = vmatmul.mubr.msk.bf16.vlgmr.msra.gmra.mrb[0].mxu1 %vm147_vm2, %v109_v16 }
 0x106   :  { %439 = vmatprep.mubr.msk.bf16.mxu1 %vm515_vm0, %v514_v0  ;;  %432 = vmatpush3.bf16.msra.mxu1 %v458_v19 }
 0x107   :  { %433 = vmatprep.subr.bf16.mxu1 %v514_v0 }
 0x10a   :  { %434 = vmatpush3.bf16.msra.mxu1 %v459_v20 }
 0x10b   :  { %435 = vmatprep.subr.bf16.mxu1 %v514_v0 }
 0x10e   :  { %436 = vmatpush3.bf16.msra.mxu1 %v460_v29 }
 0x10f   :  { %437 = vmatprep.subr.bf16.mxu1 %v514_v0 }
 0x112   :  { %438 = vmatpush3.bf16.msra.mxu1 %v461_v30 }
 0x1d8   :  { %v185_v22 = vpop.f32.mrb[0].mxu1 }
 0x1d9   :  { %v186_v23 = vadd.f32 %v366_v21, %v185_v22  ;;  %v417_v24 = vpop.f32.mrb[1].mxu1 }
 0x1da   :  { %v188_v25 = vpop.f32.mrb[2].mxu1 }
 0x1db   :  { %v191_v26 = vmax.f32 %v186_v23, 0.0  ;;  %v418_v27 = vpop.f32.mrb[3].mxu1 }
 0x1dd   :  { %v192_v28 = vpack.c.bf16 %v191_v26, %v191_v26 }
 0x1df   :  { %428 = vmatmul.mubr.msk.bf16.vlgmr.msra.gmra.mrb[4].mxu0 %vm147_vm2, %v192_v28 }
 0x2b2   :  { %v267_v32 = vpop.f32.mrb[4].mxu0 }
 0x2b3   :  { %v268_v33 = vadd.f32 %v372_v31, %v267_v32  ;;  %v429_v34 = vpop.f32.mrb[5].mxu0 }
 0x2b4   :  { %v270_v35 = vpop.f32.mrb[6].mxu0 }
 0x2b5   :  { %v273_v36 = vmax.f32 %v268_v33, 0.0  ;;  %v430_v37 = vpop.f32.mrb[7].mxu0 }
 0x2b7   :  { %v274_v38 = vpack.c.bf16 %v273_v36, %v273_v36 }
 0x2b9   :  { %440 = vmatmul.mubr.msk.bf16.vlgmr.msra.gmra.mrb[4].mxu1 %vm147_vm2, %v274_v38 }
 0x38c   :  { %v349_v40 = vpop.f32.mrb[4].mxu1 }
 0x38d   :  { %v350_v41 = vadd.f32 %v378_v39, %v349_v40  ;;  %v441_v42 = vpop.f32.mrb[5].mxu1 }
 0x38e   :  { %v352_v43 = vpop.f32.mrb[6].mxu1 }
 0x38f   :  { %356 = vst.msk [vmem:[%s654_s6] sm:$0xff] %vm355_vm3, %v350_v41  ;;  %v442_v44 = vpop.f32.mrb[7].mxu1 }
 0x390   :  { %361 = vsyncpa [#allocation3], 1 }
 0x391   :  { %362 = vsyncpa [#allocation5], 1 }

</bundles_post_ra>
